<compile_context>
chip_gen: v7x
topology: tpu7x:2x2x1
jax: 0.10.0
libtpu: 0.0.40
codegen_flags: <defaults>
</compile_context>

<pallas_src>
import functools

import jax
import jax.numpy as jnp
from jax import lax
from jax.experimental import pallas as pl
from jax.experimental.pallas import tpu as pltpu


def _round_up(x, m):
    return ((x + m - 1) // m) * m


def _triplet_euclidean_kernel(a_ref, p_ref, n_ref, o_ref, *, margin,
                              total_batch, tile_b):
    i = pl.program_id(0)

    a = a_ref[...].astype(jnp.float32)
    p = p_ref[...].astype(jnp.float32)
    n = n_ref[...].astype(jnp.float32)

    # squared Euclidean distance over the feature (lane) axis
    d_p = a - p
    d_n = a - n
    dp = jnp.sum(d_p * d_p, axis=1, keepdims=True)   # (tile_b, 1)
    dn = jnp.sum(d_n * d_n, axis=1, keepdims=True)   # (tile_b, 1)

    losses = jnp.maximum(dp - dn + margin, 0.0)       # (tile_b, 1)

    # mask rows past the real batch (tail block); jnp.where so padded-garbage
    # rows (possibly NaN/inf) cannot leak into the sum.
    row = lax.broadcasted_iota(jnp.int32, (tile_b, 1), 0)
    valid = (i * tile_b + row) < total_batch
    losses = jnp.where(valid, losses, 0.0)

    o_ref[...] = jnp.sum(losses, axis=0, keepdims=True)   # (1, 1) partial sum


def _triplet_cosine_kernel(a_ref, p_ref, n_ref, o_ref, *, margin,
                           total_batch, tile_b, eps):
    i = pl.program_id(0)

    a = a_ref[...].astype(jnp.float32)
    p = p_ref[...].astype(jnp.float32)
    n = n_ref[...].astype(jnp.float32)

    na2 = jnp.sum(a * a, axis=1, keepdims=True)       # (tile_b, 1)
    np2 = jnp.sum(p * p, axis=1, keepdims=True)
    nn2 = jnp.sum(n * n, axis=1, keepdims=True)
    dot_ap = jnp.sum(a * p, axis=1, keepdims=True)
    dot_an = jnp.sum(a * n, axis=1, keepdims=True)

    # F.cosine_similarity(x1, x2, dim=1, eps=1e-8) with the norm-product clamp:
    # 1 / max(||a||*||x||, eps) == rsqrt(max(||a||^2 * ||x||^2, eps^2))
    cos_ap = dot_ap * lax.rsqrt(jnp.maximum(na2 * np2, eps * eps))
    cos_an = dot_an * lax.rsqrt(jnp.maximum(na2 * nn2, eps * eps))

    # relu((1 - cos_ap) - (1 - cos_an) + margin) == relu(cos_an - cos_ap + margin)
    losses = jnp.maximum(cos_an - cos_ap + margin, 0.0)   # (tile_b, 1)

    row = lax.broadcasted_iota(jnp.int32, (tile_b, 1), 0)
    valid = (i * tile_b + row) < total_batch
    losses = jnp.where(valid, losses, 0.0)

    o_ref[...] = jnp.sum(losses, axis=0, keepdims=True)   # (1, 1) partial sum


def triplet_loss(anchor, positive, negative, *, margin=1.0,
                 metric="Euclidean", tile_b=None,
                 vmem_budget_bytes=24 * 1024 * 1024):
    """Pallas TPU implementation of TripletLoss.forward. Returns a scalar."""
    assert anchor.shape == positive.shape == negative.shape
    assert anchor.ndim == 2, "expected (B, D) inputs"
    B, D = anchor.shape

    itemsize = jnp.dtype(anchor.dtype).itemsize
    # sublane packing: 8 rows for 4-byte dtypes, 16 for bf16, 32 for 1-byte
    sublane = max(8, 32 // max(itemsize, 1))

    if tile_b is None:
        # per-step VMEM footprint: 3 inputs x 2 pipeline buffers x tile_b*D*itemsize
        per_row_bytes = 3 * 2 * D * itemsize
        tile_b = max(sublane, vmem_budget_bytes // per_row_bytes)
        tile_b = min(tile_b, 4096, _round_up(B, sublane))
        tile_b = max(sublane, (tile_b // sublane) * sublane)
    else:
        assert tile_b % sublane == 0, f"tile_b must be a multiple of {sublane}"

    num_blocks = pl.cdiv(B, tile_b)

    if metric == "Cosine":
        kernel = functools.partial(_triplet_cosine_kernel,
                                   margin=float(margin), total_batch=B,
                                   tile_b=tile_b, eps=1e-8)
    else:
        kernel = functools.partial(_triplet_euclidean_kernel,
                                   margin=float(margin), total_batch=B,
                                   tile_b=tile_b)

    in_spec = pl.BlockSpec((tile_b, D), lambda i: (i, 0))
    partials = pl.pallas_call(
        kernel,
        out_shape=jax.ShapeDtypeStruct((num_blocks, 1), jnp.float32),
        grid_spec=pltpu.PrefetchScalarGridSpec(
            num_scalar_prefetch=0,
            grid=(num_blocks,),
            in_specs=[in_spec, in_spec, in_spec],
            out_specs=pl.BlockSpec((1, 1), lambda i: (i, 0)),
        ),
        compiler_params=pltpu.CompilerParams(
            # each block writes its own partial sum -> grid axis is parallel
            # (lets Mosaic shard across both TensorCores on v7x).
            dimension_semantics=("parallel",),
        ),
    )(anchor, positive, negative)

    # tiny final reduction (num_blocks elements) + mean in plain XLA
    return jnp.sum(partials) / jnp.float32(B)


def _triplet_loss_ref(anchor, positive, negative, *, margin=1.0,
                      metric="Euclidean"):
    anchor = anchor.astype(jnp.float32)
    positive = positive.astype(jnp.float32)
    negative = negative.astype(jnp.float32)
    if metric == "Cosine":
        def cos(x1, x2):
            num = jnp.sum(x1 * x2, axis=1)
            den = jnp.maximum(
                jnp.linalg.norm(x1, axis=1) * jnp.linalg.norm(x2, axis=1), 1e-8)
            return num / den
        dp = 1.0 - cos(anchor, positive)
        dn = 1.0 - cos(anchor, negative)
    else:
        dp = jnp.sum((anchor - positive) ** 2, axis=1)
        dn = jnp.sum((anchor - negative) ** 2, axis=1)
    return jnp.mean(jnp.maximum(dp - dn + margin, 0.0))


if __name__ == "__main__":
    key = jax.random.PRNGKey(0)
    k1, k2, k3 = jax.random.split(key, 3)

    # small, tile-friendly shapes
    B, D = 16, 128
    anchor = jax.random.normal(k1, (B, D), dtype=jnp.float32)
    positive = jax.random.normal(k2, (B, D), dtype=jnp.float32)
    negative = jax.random.normal(k3, (B, D), dtype=jnp.float32)

    # Euclidean (default metric of the PyTorch module)
    out_euc = triplet_loss(anchor, positive, negative,
                           margin=1.0, metric="Euclidean")
    jax.block_until_ready(out_euc)
    ref_euc = _triplet_loss_ref(anchor, positive, negative,
                                margin=1.0, metric="Euclidean")
    assert jnp.allclose(out_euc, ref_euc, rtol=1e-5, atol=1e-5), (out_euc, ref_euc)

    # Cosine variant
    out_cos = triplet_loss(anchor, positive, negative,
                           margin=1.0, metric="Cosine")
    jax.block_until_ready(out_cos)
    ref_cos = _triplet_loss_ref(anchor, positive, negative,
                                margin=1.0, metric="Cosine")
    assert jnp.allclose(out_cos, ref_cos, rtol=1e-5, atol=1e-5), (out_cos, ref_cos)

    # Batch NOT divisible by the sublane/tile size -> exercises the tail mask
    Bo = 13
    ao = jax.random.normal(k1, (Bo, D), dtype=jnp.float32)
    po = jax.random.normal(k2, (Bo, D), dtype=jnp.float32)
    no = jax.random.normal(k3, (Bo, D), dtype=jnp.float32)
    for m in ("Euclidean", "Cosine"):
        got = triplet_loss(ao, po, no, margin=1.0, metric=m)
        jax.block_until_ready(got)
        want = _triplet_loss_ref(ao, po, no, margin=1.0, metric=m)
        assert jnp.allclose(got, want, rtol=1e-5, atol=1e-5), (m, got, want)

    print("KERNEL_OK")
</pallas_src>

<mosaic_0001>
module attributes {stable_mosaic.version = 11 : i64} {
  func.func @_triplet_euclidean_kernel(%arg0: i32, %arg1: memref<16x128xf32, #tpu.memory_space<vmem>>, %arg2: memref<16x128xf32, #tpu.memory_space<vmem>>, %arg3: memref<16x128xf32, #tpu.memory_space<vmem>>, %arg4: memref<1x1xf32, #tpu.memory_space<vmem>>) attributes {dimension_semantics = [#tpu.dimension_semantics<parallel>], iteration_bounds = array<i64: 1>, scalar_prefetch = 0 : i64, scratch_operands = 0 : i64, tpu.core_type = #tpu.core_type<tc>, window_params = [{transform_indices = @transform_0, window_bounds = array<i64: 16, 128>}, {transform_indices = @transform_1, window_bounds = array<i64: 16, 128>}, {transform_indices = @transform_2, window_bounds = array<i64: 16, 128>}, {transform_indices = @transform_3, window_bounds = array<i64: 1, 1>}]} {
    %c0 = arith.constant 0 : index
    %c0_0 = arith.constant 0 : index
    %0 = vector.load %arg1[%c0, %c0_0] : memref<16x128xf32, #tpu.memory_space<vmem>>, vector<16x128xf32>
    %c0_1 = arith.constant 0 : index
    %c0_2 = arith.constant 0 : index
    %1 = vector.load %arg2[%c0_1, %c0_2] : memref<16x128xf32, #tpu.memory_space<vmem>>, vector<16x128xf32>
    %c0_3 = arith.constant 0 : index
    %c0_4 = arith.constant 0 : index
    %2 = vector.load %arg3[%c0_3, %c0_4] : memref<16x128xf32, #tpu.memory_space<vmem>>, vector<16x128xf32>
    %3 = arith.subf %0, %1 : vector<16x128xf32>
    %4 = arith.subf %0, %2 : vector<16x128xf32>
    %5 = arith.mulf %3, %3 : vector<16x128xf32>
    %cst = arith.constant dense<0.000000e+00> : vector<16xf32>
    %6 = vector.multi_reduction <add>, %5, %cst [1] : vector<16x128xf32> to vector<16xf32>
    %7 = vector.shape_cast %6 : vector<16xf32> to vector<16x1xf32>
    %8 = arith.mulf %4, %4 : vector<16x128xf32>
    %cst_5 = arith.constant dense<0.000000e+00> : vector<16xf32>
    %9 = vector.multi_reduction <add>, %8, %cst_5 [1] : vector<16x128xf32> to vector<16xf32>
    %10 = vector.shape_cast %9 : vector<16xf32> to vector<16x1xf32>
    %11 = arith.subf %7, %10 : vector<16x1xf32>
    %cst_6 = arith.constant 1.000000e+00 : f32
    %12 = vector.broadcast %cst_6 : f32 to vector<16x1xf32>
    %13 = arith.addf %11, %12 : vector<16x1xf32>
    %cst_7 = arith.constant 0.000000e+00 : f32
    %14 = vector.broadcast %cst_7 : f32 to vector<16x1xf32>
    %15 = arith.maximumf %13, %14 : vector<16x1xf32>
    %16 = tpu.iota {dimensions = array<i32: 0>} : vector<16x1xi32>
    %c16_i32 = arith.constant 16 : i32
    %17 = arith.muli %arg0, %c16_i32 : i32
    %18 = vector.broadcast %17 : i32 to vector<16x1xi32>
    %19 = arith.addi %18, %16 : vector<16x1xi32>
    %c16_i32_8 = arith.constant 16 : i32
    %20 = vector.broadcast %c16_i32_8 : i32 to vector<16x1xi32>
    %21 = arith.cmpi slt, %19, %20 : vector<16x1xi32>
    %cst_9 = arith.constant 0.000000e+00 : f32
    %22 = vector.broadcast %cst_9 : f32 to vector<16x1xf32>
    %23 = arith.select %21, %15, %22 : vector<16x1xi1>, vector<16x1xf32>
    %cst_10 = arith.constant dense<0.000000e+00> : vector<1xf32>
    %24 = vector.multi_reduction <add>, %23, %cst_10 [0] : vector<16x1xf32> to vector<1xf32>
    %25 = vector.shape_cast %24 : vector<1xf32> to vector<1x1xf32>
    %c0_11 = arith.constant 0 : index
    %c0_12 = arith.constant 0 : index
    %26 = vector.load %arg4[%c0_11, %c0_12] : memref<1x1xf32, #tpu.memory_space<vmem>>, vector<1x1xf32>
    tpu.vector_store %arg4[%c0_11, %c0_12], %25 {strides = array<i32>} : memref<1x1xf32, #tpu.memory_space<vmem>>, vector<1x1xf32>,
    return
  }
  func.func @transform_0(%arg0: i32) -> (i32, i32) {
    %c0_i32 = arith.constant 0 : i32
    %c0_i32_0 = arith.constant 0 : i32
    return %arg0, %c0_i32 : i32, i32
  }
  func.func @transform_1(%arg0: i32) -> (i32, i32) {
    %c0_i32 = arith.constant 0 : i32
    %c0_i32_0 = arith.constant 0 : i32
    return %arg0, %c0_i32 : i32, i32
  }
  func.func @transform_2(%arg0: i32) -> (i32, i32) {
    %c0_i32 = arith.constant 0 : i32
    %c0_i32_0 = arith.constant 0 : i32
    return %arg0, %c0_i32 : i32, i32
  }
  func.func @transform_3(%arg0: i32) -> (i32, i32) {
    %c0_i32 = arith.constant 0 : i32
    %c0_i32_0 = arith.constant 0 : i32
    return %arg0, %c0_i32 : i32, i32
  }
}

</mosaic_0001>

<bundles_post_ra>
// kernel: tpu_custom_call.1
= control target key start
LH: loop header
LB: loop body
LE: loop exit
PB: predicated region body
PF: predicated region fallthrough
CT: control target
= control target key end

     0   :  { %8 = vsyncpa [#allocation3], 0  ;;  %s310_s0 = inlined_call_operand.hbm [shape: f32[16,128], index: 0, kind: input, shape index: {}]   ;;  %s311_s1 = inlined_call_operand.hbm [shape: f32[16,128], index: 1, kind: input, shape index: {}]   ;;  %s312_s2 = inlined_call_operand.hbm [shape: f32[16,128], index: 2, kind: input, shape index: {}]   ;;  %s313_s3 = inlined_call_operand.hbm [shape: f32[1,1], index: 3, kind: output, shape index: {}]  }
   0x1   :  { %9 = vsyncpa [#allocation6], 0 }
   0x2   :  { %10 = vsyncpa [#allocation4], 0  ;;  %s220_s12 = smov [#allocation5]   ;;  %s221_s14 = smov [#allocation2]  }
   0x3   :  { %s28_s13 = sshll.u32 %s220_s12, 4  ;;  %s16_s15 = sshll.u32 %s221_s14, 4  ;;  %s29_s13 = int_to_ptr.vmem [resolvable:$true] %s28_s13  ;;  %s246_s15 = int_to_ptr.vmem [resolvable:$true] %s16_s15 }
   0x4   :  { %s126_s18 = scalar_lea.hbm %s311_s1, 256 }
   0x5   :  { %p127_p0 = scmp.ne.s32.totalorder %s311_s1, %s126_s18  ;;  %p130_p1 = scmp.lt.u32.totalorder %s126_s18, %s311_s1 }
   0x7   :  { %p132_p2 = pnand %p130_p1, %p127_p0 }
   0x9   :  { %135 = shalt.err (!%p132_p2)
}
   0xa   :  { %s136_s23 = scalar_lea.vmem %s29_s13, 256  ;;  %p141_p4 = scmp.lt.s32.totalorder %s29_s13, %s29_s13 }
   0xb   :  { %p137_p3 = scmp.ne.s32.totalorder %s29_s13, %s136_s23  ;;  %p142_p5 = scmp.lt.s32.totalorder %s136_s23, %s136_s23 }
   0xd   :  { %p143_p6 = por %p142_p5, %p141_p4 }
   0xf   :  { %p144_p7 = pnand %p143_p6, %p137_p3 }
  0x11   :  { %147 = shalt.err (!%p144_p7)
}
  0x12   :  { %s222_s24 = smov 128   ;;  %s223_s25 = smov 8  }
  0x13   :  { %34 = dma.hbm_to_vmem [thread:$0]  %s311_s1, 256, %s29_s13, [#allocation6], %s222_s24, %s222_s24, %s223_s25  }
  0x14   :  { %s148_s30 = scalar_lea.hbm %s310_s0, 256 }
  0x15   :  { %p149_p8 = scmp.ne.s32.totalorder %s310_s0, %s148_s30  ;;  %p152_p9 = scmp.lt.u32.totalorder %s148_s30, %s310_s0 }
  0x17   :  { %p154_p10 = pnand %p152_p9, %p149_p8 }
  0x19   :  { %157 = shalt.err (!%p154_p10)
}
  0x1a   :  { %s158_s8 = scalar_lea.vmem %s246_s15, 256  ;;  %p163_p12 = scmp.lt.s32.totalorder %s246_s15, %s246_s15 }
  0x1b   :  { %p159_p11 = scmp.ne.s32.totalorder %s246_s15, %s158_s8  ;;  %p164_p13 = scmp.lt.s32.totalorder %s158_s8, %s158_s8 }
  0x1d   :  { %p165_p0 = por %p164_p13, %p163_p12 }
  0x1f   :  { %p166_p1 = pnand %p165_p0, %p159_p11 }
  0x21   :  { %169 = shalt.err (!%p166_p1)
}
  0x22   :  { %22 = dma.hbm_to_vmem [thread:$0]  %s310_s0, 256, %s246_s15, [#allocation3], %s222_s24, %s222_s24, %s223_s25  }
  0x23   :  { %s224_s10 = smov [#allocation7]   ;;  %s170_s14 = scalar_lea.hbm %s312_s2, 256 }
  0x24   :  { %s40_s11 = sshll.u32 %s224_s10, 4  ;;  %p171_p2 = scmp.ne.s32.totalorder %s312_s2, %s170_s14  ;;  %s41_s11 = int_to_ptr.vmem [resolvable:$true] %s40_s11 }
  0x25   :  { %p174_p3 = scmp.lt.u32.totalorder %s170_s14, %s312_s2 }
  0x27   :  { %p176_p4 = pnand %p174_p3, %p171_p2 }
  0x29   :  { %179 = shalt.err (!%p176_p4)
}
  0x2a   :  { %s180_s20 = scalar_lea.vmem %s41_s11, 256  ;;  %p185_p6 = scmp.lt.s32.totalorder %s41_s11, %s41_s11 }
  0x2b   :  { %p181_p5 = scmp.ne.s32.totalorder %s41_s11, %s180_s20  ;;  %p186_p7 = scmp.lt.s32.totalorder %s180_s20, %s180_s20 }
  0x2d   :  { %p187_p8 = por %p186_p7, %p185_p6 }
  0x2f   :  { %p188_p9 = pnand %p187_p8, %p181_p5 }
  0x31   :  { %191 = shalt.err (!%p188_p9)
}
  0x32   :  { %46 = dma.hbm_to_vmem [thread:$0]  %s312_s2, 256, %s41_s11, [#allocation6], %s222_s24, %s222_s24, %s223_s25  }
  0x33   :  { %214 = dma.done.wait [#allocation3], 256  }
  0x34   :  { %215 = vsyncadd [#allocation3], 4294967040 }
  0x35   :  { %216 = dma.done.wait [#allocation6], 512  }
  0x36   :  { %217 = vsyncadd [#allocation6], 4294966784  ;;  %v56_v0 = vld [vmem:[#allocation2] sm:$0xff]  ;;  %v58_v2 = vld [vmem:[#allocation5] sm:$0xff]  ;;  %s225_s2 = smov [#allocation8]   ;;  %vm102_vm0 = vcmask 0  }
  0x37   :  { %v60_v1 = vld [vmem:[#allocation7] sm:$0xff]  ;;  %v62_v4 = vsub.f32 %v56_v0, %v58_v2  ;;  %v57_v5 = vld [vmem:[#allocation2 + $0x8] sm:$0xff]  ;;  %v59_v7 = vld [vmem:[#allocation5 + $0x8] sm:$0xff]  ;;  %s110_s21 = sshll.u32 %s225_s2, 4  ;;  %s111_s21 = int_to_ptr.vmem [resolvable:$true] %s110_s21 }
  0x38   :  { %v64_v3 = vsub.f32 %v56_v0, %v60_v1  ;;  %v61_v6 = vld [vmem:[#allocation7 + $0x8] sm:$0xff]  ;;  %v63_v9 = vsub.f32 %v57_v5, %v59_v7  ;;  %s192_s22 = scalar_lea.vmem %s111_s21, 16  ;;  %s196_s23 = scalar_lea.vmem %s111_s21, 32 }
  0x39   :  { %v65_v8 = vsub.f32 %v57_v5, %v61_v6  ;;  %v66_v11 = vmul.f32 %v62_v4, %v62_v4  ;;  %p193_p10 = scmp.ne.s32.totalorder %s111_s21, %s192_s22  ;;  %p197_p11 = scmp.lt.s32.totalorder %s111_s21, %s111_s21 }
  0x3a   :  { %v72_v10 = vmul.f32 %v64_v3, %v64_v3  ;;  %v67_v13 = vmul.f32 %v63_v9, %v63_v9  ;;  %p198_p12 = scmp.lt.s32.totalorder %s196_s23, %s192_s22 }
  0x3b   :  { %68 = vadd.xlane.f32.xlu0 %v66_v11  ;;  %v73_v12 = vmul.f32 %v65_v8, %v65_v8 }
  0x3c   :  { %74 = vadd.xlane.f32.xlu1 %v72_v10  ;;  %p199_p13 = por %p198_p12, %p197_p11 }
  0x3e   :  { %p200_p0 = pnand %p199_p13, %p193_p10 }
  0x3f   :  { %70 = vadd.xlane.f32.xlu0 %v67_v13 }
  0x40   :  { %76 = vadd.xlane.f32.xlu1 %v73_v12 }
  0xc8   :  { %v69_v15 = vpop.xlane.xlu0 %68 }
  0xc9   :  { %v75_v14 = vpop.xlane.xlu1 %74 }
  0xca   :  { %v78_v16 = vsub.f32 %v69_v15, %v75_v14 }
  0xcc   :  { %v71_v18 = vpop.xlane.xlu0 %70  ;;  %v80_v19 = vadd.f32 1.0, %v78_v16 }
  0xcd   :  { %v77_v17 = vpop.xlane.xlu1 %76 }
  0xce   :  { %v79_v20 = vsub.f32 %v71_v18, %v77_v17  ;;  %v82_v22 = vmax.f32 %v80_v19, 0.0 }
  0xd0   :  { %v81_v21 = vadd.f32 1.0, %v79_v20 }
  0xd2   :  { %v83_v23 = vmax.f32 %v81_v21, 0.0 }
  0xd4   :  { %v95_v24 = vadd.f32 %v83_v23, %v82_v22 }
  0xd6   :  { %v96_v25 = vrot.slane %v95_v24, 4 }
  0xd8   :  { %v97_v26 = vadd.f32 %v96_v25, %v95_v24 }
  0xda   :  { %v98_v27 = vrot.slane %v97_v26, 2 }
  0xdc   :  { %v99_v28 = vadd.f32 %v98_v27, %v97_v26 }
  0xde   :  { %v100_v29 = vrot.slane %v99_v28, 1 }
  0xe0   :  { %v101_v30 = vadd.f32 %v100_v29, %v99_v28 }
  0xe2   :  { %103 = vst.msk [vmem:[#allocation8] sm:$0x1] %vm102_vm0, %v101_v30 }
  0xe3   :  { %203 = shalt.err (!%p200_p0)
}
  0xe4   :  { %s204_s26 = scalar_lea.hbm %s313_s3, 16 }
  0xe5   :  { %p205_p1 = scmp.ne.s32.totalorder %s313_s3, %s204_s26  ;;  %p208_p2 = scmp.lt.u32.totalorder %s204_s26, %s313_s3 }
  0xe7   :  { %p210_p3 = pnand %p208_p2, %p205_p1 }
  0xe9   :  { %213 = shalt.err (!%p210_p3)
}
  0xea   :  { %113 = dma.vmem_to_hbm [thread:$0]  %s111_s21, 16, %s313_s3, [#allocation4]  }
  0xeb   :  { %218 = dma.done.wait [#allocation4], 16  }
  0xec   :  { %219 = vsyncadd [#allocation4], 4294967280 }
  0xed   :  { %117 = vsyncpa [#allocation3], 1 }
  0xee   :  { %118 = vsyncpa [#allocation6], 1 }
  0xef   :  { %119 = vsyncpa [#allocation4], 1 }

</bundles_post_ra>
